<compile_context>
chip_gen: v7x
topology: tpu7x:2x2x1
jax: 0.10.0
libtpu: 0.0.40
codegen_flags: <defaults>
</compile_context>

<pallas_src>
import math
import jax
import jax.numpy as jnp
from jax import lax
from jax.experimental import pallas as pl
from jax.experimental.pallas import tpu as pltpu  # noqa: F401  (not needed: gridless, default VMEM specs)

# Model / problem sizes (small, consistent with the module)
B, S, E = 2, 8, 32          # batch, seq, embed_size
H = 4                       # heads
D_K = E // H
FWD = 4                     # forward_expansion
HID = E * FWD               # == 128 == H * E  (used for the fused value/output slab)
EPS = 1e-6
BS = B * S

# Explicit precision decision (review): DEFAULT = one bf16 MXU pass per matmul.
MM_PREC = lax.Precision.DEFAULT


def transformer_block_kernel(x_ref, bias_ref, w_qk_ref, w_big_ref, w2_ref, vec_ref,
                             out_ref):
    x = x_ref[...]                       # (3, BS, E): stacked [query, key, value]
    q_in = x[0]                          # residual input (raw query)

    # ---- unpack the single packed bias / LayerNorm-param slab (one DMA) ----
    vec = vec_ref[...]                   # (8, 128)
    bq = vec[0:1, 0:E]; bk = vec[0:1, E:2 * E]
    bo = vec[0:1, 2 * E:3 * E]; b2 = vec[0:1, 3 * E:4 * E]
    a1 = vec[1:2, 0:E]; c1 = vec[1:2, E:2 * E]
    a2 = vec[1:2, 2 * E:3 * E]; c2 = vec[1:2, 3 * E:4 * E]
    b1 = vec[2:3, :]                     # (1, HID)

    w_qk = w_qk_ref[...]                 # (2, E, E): [wq*1/sqrt(d_k), wk]
    w_big = w_big_ref[...]               # (2, E, 128): [wv·wo (head-fused), w1]

    # ---- Q / K / V' projections: three rank-2 MXU issues, no broadcast of x ----
    q_flat = jnp.dot(x[0], w_qk[0], preferred_element_type=jnp.float32,
                     precision=MM_PREC) + bq                       # (BS, E), pre-scaled
    k_flat = jnp.dot(x[1], w_qk[1], preferred_element_type=jnp.float32,
                     precision=MM_PREC) + bk                       # (BS, E)
    # value projection with fc_out folded in: lanes [h*E:(h+1)*E] hold value @ (Wv_h Wo_h)
    v_fold = jnp.dot(x[2], w_big[0], preferred_element_type=jnp.float32,
                     precision=MM_PREC)                            # (BS, H*E) = (16, 128)

    bias = bias_ref[...]                 # (BS, BS): 0 keep / -1e9 masked / -1e30 cross-batch

    # ---- attention: unrolled over H=4 heads, static lane slices, no relayouts ----
    head_outs = []
    for h in range(H):
        qh = q_flat[:, h * D_K:(h + 1) * D_K]                      # (BS, d_k)
        kh = k_flat[:, h * D_K:(h + 1) * D_K]                      # (BS, d_k)
        s = jnp.einsum("qd,kd->qk", qh, kh,
                       preferred_element_type=jnp.float32,
                       precision=MM_PREC) + bias                   # (BS, BS)
        p = jnp.exp(s - jnp.max(s, axis=-1, keepdims=True))
        p = p * pl.reciprocal(jnp.sum(p, axis=-1, keepdims=True), approx=False)
        # P_h @ (value @ Wv_h Wo_h): (16,16)@(16,32) — already the fc_out contribution
        head_outs.append(jnp.dot(p, v_fold[:, h * E:(h + 1) * E],
                                 preferred_element_type=jnp.float32,
                                 precision=MM_PREC))
    # bo was pre-folded with bv @ wo in the wrapper.
    logits = head_outs[0] + head_outs[1] + head_outs[2] + head_outs[3] + bo   # (BS, E)

    def layer_norm(t, a, b):
        mean = jnp.mean(t, axis=-1, keepdims=True)
        diff = t - mean
        # torch.std(): unbiased (divide by E-1); eps added to std (not var).
        std = jnp.sqrt(jnp.sum(diff * diff, axis=-1, keepdims=True) / (E - 1.0))
        inv = pl.reciprocal(std + EPS, approx=False)               # (BS,1) EUP reciprocal
        return a * (diff * inv) + b

    # residual + norm1 (+ dropout == identity)
    x1 = layer_norm(logits + q_in, a1, c1)

    # ---- feed forward ----
    hidden = jnp.maximum(
        jnp.dot(x1, w_big[1], preferred_element_type=jnp.float32,
                precision=MM_PREC) + b1, 0.0)                      # (BS, HID)
    ff = jnp.dot(hidden, w2_ref[...], preferred_element_type=jnp.float32,
                 precision=MM_PREC) + b2                           # (BS, E)

    # residual + norm2 (+ dropout == identity); single contiguous (BS, E) store
    out_ref[...] = layer_norm(ff + x1, a2, c2)


@jax.jit
def transformer_block(query, key, value, mask, params):
    (wq, bq, wk, bk, wv, bv, wo, bo, a1, c1, a2, c2, w1, b1, w2, b2) = params
    scale = 1.0 / math.sqrt(D_K)

    # ---- wrapper-side repacking (layout plumbing; free relative to the kernel) ----
    x_qkv = jnp.stack([query, key, value]).reshape(3, BS, E)

    # Q/K projection weights, with 1/sqrt(d_k) folded into the query side.
    w_qk = jnp.stack([wq * scale, wk])                             # (2, E, E)

    # Fold fc_out into the value projection, per head:  Wvo[:, h*E:(h+1)*E] = Wv_h @ Wo_h
    w_vo = jnp.einsum("ehd,hdf->ehf",
                      wv.reshape(E, H, D_K),
                      wo.reshape(H, D_K, E)).reshape(E, H * E)     # (E, 128)
    w_big = jnp.stack([w_vo, w1])                                  # (2, E, 128)
    bo_fold = (bo + bv @ wo).reshape(E)                            # value+output bias fold

    # Pack every sub-vreg vector operand into a single (8,128) slab (one DMA).
    vec = jnp.zeros((8, 4 * E), jnp.float32)
    vec = vec.at[0].set(jnp.concatenate(
        [(bq * scale).reshape(E), bk.reshape(E), bo_fold, b2.reshape(E)]))
    vec = vec.at[1].set(jnp.concatenate(
        [a1.reshape(E), c1.reshape(E), a2.reshape(E), c2.reshape(E)]))
    vec = vec.at[2].set(b1.reshape(HID))

    # Additive attention bias over the flattened (B*S, B*S) score matrix:
    #   0 where attended, -1e9 where the user mask is 0 (torch masked_fill value),
    #   -1e30 for cross-batch pairs (exactly zero after softmax).
    mask_bias = (mask.astype(jnp.float32) - 1.0) * 1e9             # (B, S, S)
    same_batch = jnp.eye(B, dtype=bool)[:, None, :, None]          # (B,1,B,1)
    bias_full = jnp.where(same_batch, mask_bias[:, :, None, :], -1e30)
    bias_full = bias_full.reshape(BS, BS).astype(jnp.float32)

    out_flat = pl.pallas_call(
        transformer_block_kernel,
        out_shape=jax.ShapeDtypeStruct((BS, E), jnp.float32),
    )(x_qkv, bias_full, w_qk, w_big, w2, vec)
    return out_flat.reshape(B, S, E)


def reference(query, key, value, mask, params):
    (wq, bq, wk, bk, wv, bv, wo, bo, a1, c1, a2, c2, w1, b1, w2, b2) = params

    def ln(x, a, b):
        mean = x.mean(-1, keepdims=True)
        std = jnp.sqrt(((x - mean) ** 2).sum(-1, keepdims=True) / (E - 1))
        return a * (x - mean) / (std + EPS) + b

    qp = (query @ wq + bq[0]).reshape(B, S, H, D_K).transpose(0, 2, 1, 3)
    kp = (key @ wk + bk[0]).reshape(B, S, H, D_K).transpose(0, 2, 1, 3)
    vp = (value @ wv + bv[0]).reshape(B, S, H, D_K).transpose(0, 2, 1, 3)
    scores = jnp.einsum("bhqd,bhkd->bhqk", qp, kp) / math.sqrt(D_K)
    scores = jnp.where(mask[:, None] == 0, -1e9, scores)
    p = jax.nn.softmax(scores, axis=-1)
    attn = jnp.einsum("bhqk,bhkd->bhqd", p, vp).transpose(0, 2, 1, 3).reshape(B, S, E)
    logits = attn @ wo + bo[0]
    x = ln(logits + query, a1[0], c1[0])
    ff = jnp.maximum(x @ w1 + b1[0], 0.0) @ w2 + b2[0]
    return ln(ff + x, a2[0], c2[0])


def make_params(key):
    ks = jax.random.split(key, 12)
    scale = 0.1
    wq = scale * jax.random.normal(ks[0], (E, E), jnp.float32)
    bq = scale * jax.random.normal(ks[1], (1, E), jnp.float32)
    wk = scale * jax.random.normal(ks[2], (E, E), jnp.float32)
    bk = scale * jax.random.normal(ks[3], (1, E), jnp.float32)
    wv = scale * jax.random.normal(ks[4], (E, E), jnp.float32)
    bv = scale * jax.random.normal(ks[5], (1, E), jnp.float32)
    wo = scale * jax.random.normal(ks[6], (E, E), jnp.float32)
    bo = scale * jax.random.normal(ks[7], (1, E), jnp.float32)
    # LayerNorm params exactly as the module initializes them
    a1 = jnp.ones((1, E), jnp.float32)
    c1 = jnp.zeros((1, E), jnp.float32)
    a2 = jnp.ones((1, E), jnp.float32)
    c2 = jnp.zeros((1, E), jnp.float32)
    w1 = scale * jax.random.normal(ks[8], (E, HID), jnp.float32)
    b1 = scale * jax.random.normal(ks[9], (1, HID), jnp.float32)
    w2 = scale * jax.random.normal(ks[10], (HID, E), jnp.float32)
    b2 = scale * jax.random.normal(ks[11], (1, E), jnp.float32)
    return (wq, bq, wk, bk, wv, bv, wo, bo, a1, c1, a2, c2, w1, b1, w2, b2)


if __name__ == "__main__":
    root = jax.random.PRNGKey(0)
    kq, kk, kv, kp = jax.random.split(root, 4)
    query = jax.random.normal(kq, (B, S, E), jnp.float32)
    key_in = jax.random.normal(kk, (B, S, E), jnp.float32)
    value = jax.random.normal(kv, (B, S, E), jnp.float32)
    # causal mask (1 = keep, 0 = masked), same for every batch element
    mask = jnp.broadcast_to(jnp.tril(jnp.ones((S, S), jnp.float32)), (B, S, S))

    params = make_params(kp)

    out = transformer_block(query, key_in, value, mask, params)
    out = jax.block_until_ready(out)

    ref = reference(query, key_in, value, mask, params)
    assert out.shape == (B, S, E)
    assert jnp.allclose(out, ref, atol=2e-3, rtol=2e-3), "mismatch vs JAX reference"

    print("KERNEL_OK")
</pallas_src>

<mosaic_0001>
module attributes {stable_mosaic.version = 11 : i64} {
  func.func @transformer_block_kernel(%arg0: memref<3x16x32xf32, #tpu.memory_space<vmem>>, %arg1: memref<16x16xf32, #tpu.memory_space<vmem>>, %arg2: memref<2x32x32xf32, #tpu.memory_space<vmem>>, %arg3: memref<2x32x128xf32, #tpu.memory_space<vmem>>, %arg4: memref<128x32xf32, #tpu.memory_space<vmem>>, %arg5: memref<8x128xf32, #tpu.memory_space<vmem>>, %arg6: memref<16x32xf32, #tpu.memory_space<vmem>>) attributes {dimension_semantics = [], scalar_prefetch = 0 : i64, scratch_operands = 0 : i64, tpu.core_type = #tpu.core_type<tc>} {
    %c0 = arith.constant 0 : index
    %c0_0 = arith.constant 0 : index
    %c0_1 = arith.constant 0 : index
    %0 = vector.load %arg0[%c0, %c0_0, %c0_1] : memref<3x16x32xf32, #tpu.memory_space<vmem>>, vector<3x16x32xf32>
    %1 = vector.extract_strided_slice %0 {offsets = [0, 0, 0], sizes = [1, 16, 32], strides = [1, 1, 1]} : vector<3x16x32xf32> to vector<1x16x32xf32>
    %2 = vector.shape_cast %1 : vector<1x16x32xf32> to vector<16x32xf32>
    %c0_2 = arith.constant 0 : index
    %c0_3 = arith.constant 0 : index
    %3 = vector.load %arg5[%c0_2, %c0_3] : memref<8x128xf32, #tpu.memory_space<vmem>>, vector<8x128xf32>
    %4 = vector.extract_strided_slice %3 {offsets = [0, 0], sizes = [1, 32], strides = [1, 1]} : vector<8x128xf32> to vector<1x32xf32>
    %5 = vector.extract_strided_slice %3 {offsets = [0, 32], sizes = [1, 32], strides = [1, 1]} : vector<8x128xf32> to vector<1x32xf32>
    %6 = vector.extract_strided_slice %3 {offsets = [0, 64], sizes = [1, 32], strides = [1, 1]} : vector<8x128xf32> to vector<1x32xf32>
    %7 = vector.extract_strided_slice %3 {offsets = [0, 96], sizes = [1, 32], strides = [1, 1]} : vector<8x128xf32> to vector<1x32xf32>
    %8 = vector.extract_strided_slice %3 {offsets = [1, 0], sizes = [1, 32], strides = [1, 1]} : vector<8x128xf32> to vector<1x32xf32>
    %9 = vector.extract_strided_slice %3 {offsets = [1, 32], sizes = [1, 32], strides = [1, 1]} : vector<8x128xf32> to vector<1x32xf32>
    %10 = vector.extract_strided_slice %3 {offsets = [1, 64], sizes = [1, 32], strides = [1, 1]} : vector<8x128xf32> to vector<1x32xf32>
    %11 = vector.extract_strided_slice %3 {offsets = [1, 96], sizes = [1, 32], strides = [1, 1]} : vector<8x128xf32> to vector<1x32xf32>
    %12 = vector.extract_strided_slice %3 {offsets = [2, 0], sizes = [1, 128], strides = [1, 1]} : vector<8x128xf32> to vector<1x128xf32>
    %c0_4 = arith.constant 0 : index
    %c0_5 = arith.constant 0 : index
    %c0_6 = arith.constant 0 : index
    %13 = vector.load %arg2[%c0_4, %c0_5, %c0_6] : memref<2x32x32xf32, #tpu.memory_space<vmem>>, vector<2x32x32xf32>
    %c0_7 = arith.constant 0 : index
    %c0_8 = arith.constant 0 : index
    %c0_9 = arith.constant 0 : index
    %14 = vector.load %arg3[%c0_7, %c0_8, %c0_9] : memref<2x32x128xf32, #tpu.memory_space<vmem>>, vector<2x32x128xf32>
    %15 = vector.extract_strided_slice %0 {offsets = [0, 0, 0], sizes = [1, 16, 32], strides = [1, 1, 1]} : vector<3x16x32xf32> to vector<1x16x32xf32>
    %16 = vector.shape_cast %15 : vector<1x16x32xf32> to vector<16x32xf32>
    %17 = vector.extract_strided_slice %13 {offsets = [0, 0, 0], sizes = [1, 32, 32], strides = [1, 1, 1]} : vector<2x32x32xf32> to vector<1x32x32xf32>
    %18 = vector.shape_cast %17 : vector<1x32x32xf32> to vector<32x32xf32>
    %cst = arith.constant dense<0.000000e+00> : vector<16x32xf32>
    %19 = tpu.matmul %16, %18, %cst {dimension_numbers = #tpu.dot_dimension_numbers<[1], [0], [0], [1], [0, 0, 1, 1], [], []>} : vector<16x32xf32>, vector<32x32xf32>, vector<16x32xf32> -> vector<16x32xf32>
    %20 = vector.broadcast %4 : vector<1x32xf32> to vector<16x32xf32>
    %21 = arith.addf %19, %20 : vector<16x32xf32>
    %22 = vector.extract_strided_slice %0 {offsets = [1, 0, 0], sizes = [1, 16, 32], strides = [1, 1, 1]} : vector<3x16x32xf32> to vector<1x16x32xf32>
    %23 = vector.shape_cast %22 : vector<1x16x32xf32> to vector<16x32xf32>
    %24 = vector.extract_strided_slice %13 {offsets = [1, 0, 0], sizes = [1, 32, 32], strides = [1, 1, 1]} : vector<2x32x32xf32> to vector<1x32x32xf32>
    %25 = vector.shape_cast %24 : vector<1x32x32xf32> to vector<32x32xf32>
    %cst_10 = arith.constant dense<0.000000e+00> : vector<16x32xf32>
    %26 = tpu.matmul %23, %25, %cst_10 {dimension_numbers = #tpu.dot_dimension_numbers<[1], [0], [0], [1], [0, 0, 1, 1], [], []>} : vector<16x32xf32>, vector<32x32xf32>, vector<16x32xf32> -> vector<16x32xf32>
    %27 = vector.broadcast %5 : vector<1x32xf32> to vector<16x32xf32>
    %28 = arith.addf %26, %27 : vector<16x32xf32>
    %29 = vector.extract_strided_slice %0 {offsets = [2, 0, 0], sizes = [1, 16, 32], strides = [1, 1, 1]} : vector<3x16x32xf32> to vector<1x16x32xf32>
    %30 = vector.shape_cast %29 : vector<1x16x32xf32> to vector<16x32xf32>
    %31 = vector.extract_strided_slice %14 {offsets = [0, 0, 0], sizes = [1, 32, 128], strides = [1, 1, 1]} : vector<2x32x128xf32> to vector<1x32x128xf32>
    %32 = vector.shape_cast %31 : vector<1x32x128xf32> to vector<32x128xf32>
    %cst_11 = arith.constant dense<0.000000e+00> : vector<16x128xf32>
    %33 = tpu.matmul %30, %32, %cst_11 {dimension_numbers = #tpu.dot_dimension_numbers<[1], [0], [0], [1], [0, 0, 1, 1], [], []>} : vector<16x32xf32>, vector<32x128xf32>, vector<16x128xf32> -> vector<16x128xf32>
    %c0_12 = arith.constant 0 : index
    %c0_13 = arith.constant 0 : index
    %34 = vector.load %arg1[%c0_12, %c0_13] : memref<16x16xf32, #tpu.memory_space<vmem>>, vector<16x16xf32>
    %35 = vector.extract_strided_slice %21 {offsets = [0, 0], sizes = [16, 8], strides = [1, 1]} : vector<16x32xf32> to vector<16x8xf32>
    %36 = vector.extract_strided_slice %28 {offsets = [0, 0], sizes = [16, 8], strides = [1, 1]} : vector<16x32xf32> to vector<16x8xf32>
    "tpu.trace_start"() <{level = 10 : i32, message = "qd,kd->qk"}> : () -> ()
    %cst_14 = arith.constant dense<0.000000e+00> : vector<16x16xf32>
    %37 = tpu.matmul %35, %36, %cst_14 {dimension_numbers = #tpu.dot_dimension_numbers<[1], [1], [0], [0], [0, 0, 1, 0], [], []>} : vector<16x8xf32>, vector<16x8xf32>, vector<16x16xf32> -> vector<16x16xf32>
    "tpu.trace_stop"() : () -> ()
    %38 = arith.addf %37, %34 : vector<16x16xf32>
    %cst_15 = arith.constant dense<0xFF800000> : vector<16xf32>
    %39 = vector.multi_reduction <maximumf>, %38, %cst_15 [1] : vector<16x16xf32> to vector<16xf32>
    %40 = vector.shape_cast %39 : vector<16xf32> to vector<16x1xf32>
    %41 = vector.broadcast %40 : vector<16x1xf32> to vector<16x16xf32>
    %42 = arith.subf %38, %41 : vector<16x16xf32>
    %43 = math.exp %42 : vector<16x16xf32>
    %cst_16 = arith.constant dense<0.000000e+00> : vector<16xf32>
    %44 = vector.multi_reduction <add>, %43, %cst_16 [1] : vector<16x16xf32> to vector<16xf32>
    %45 = vector.shape_cast %44 : vector<16xf32> to vector<16x1xf32>
    %46 = tpu.reciprocal %45 : vector<16x1xf32> -> vector<16x1xf32>
    %47 = vector.broadcast %46 : vector<16x1xf32> to vector<16x16xf32>
    %48 = arith.mulf %43, %47 : vector<16x16xf32>
    %49 = vector.extract_strided_slice %33 {offsets = [0, 0], sizes = [16, 32], strides = [1, 1]} : vector<16x128xf32> to vector<16x32xf32>
    %cst_17 = arith.constant dense<0.000000e+00> : vector<16x32xf32>
    %50 = tpu.matmul %48, %49, %cst_17 {dimension_numbers = #tpu.dot_dimension_numbers<[1], [0], [0], [1], [0, 0, 1, 1], [], []>} : vector<16x16xf32>, vector<16x32xf32>, vector<16x32xf32> -> vector<16x32xf32>
    %51 = vector.extract_strided_slice %21 {offsets = [0, 8], sizes = [16, 8], strides = [1, 1]} : vector<16x32xf32> to vector<16x8xf32>
    %52 = vector.extract_strided_slice %28 {offsets = [0, 8], sizes = [16, 8], strides = [1, 1]} : vector<16x32xf32> to vector<16x8xf32>
    "tpu.trace_start"() <{level = 10 : i32, message = "qd,kd->qk"}> : () -> ()
    %cst_18 = arith.constant dense<0.000000e+00> : vector<16x16xf32>
    %53 = tpu.matmul %51, %52, %cst_18 {dimension_numbers = #tpu.dot_dimension_numbers<[1], [1], [0], [0], [0, 0, 1, 0], [], []>} : vector<16x8xf32>, vector<16x8xf32>, vector<16x16xf32> -> vector<16x16xf32>
    "tpu.trace_stop"() : () -> ()
    %54 = arith.addf %53, %34 : vector<16x16xf32>
    %cst_19 = arith.constant dense<0xFF800000> : vector<16xf32>
    %55 = vector.multi_reduction <maximumf>, %54, %cst_19 [1] : vector<16x16xf32> to vector<16xf32>
    %56 = vector.shape_cast %55 : vector<16xf32> to vector<16x1xf32>
    %57 = vector.broadcast %56 : vector<16x1xf32> to vector<16x16xf32>
    %58 = arith.subf %54, %57 : vector<16x16xf32>
    %59 = math.exp %58 : vector<16x16xf32>
    %cst_20 = arith.constant dense<0.000000e+00> : vector<16xf32>
    %60 = vector.multi_reduction <add>, %59, %cst_20 [1] : vector<16x16xf32> to vector<16xf32>
    %61 = vector.shape_cast %60 : vector<16xf32> to vector<16x1xf32>
    %62 = tpu.reciprocal %61 : vector<16x1xf32> -> vector<16x1xf32>
    %63 = vector.broadcast %62 : vector<16x1xf32> to vector<16x16xf32>
    %64 = arith.mulf %59, %63 : vector<16x16xf32>
    %65 = vector.extract_strided_slice %33 {offsets = [0, 32], sizes = [16, 32], strides = [1, 1]} : vector<16x128xf32> to vector<16x32xf32>
    %cst_21 = arith.constant dense<0.000000e+00> : vector<16x32xf32>
    %66 = tpu.matmul %64, %65, %cst_21 {dimension_numbers = #tpu.dot_dimension_numbers<[1], [0], [0], [1], [0, 0, 1, 1], [], []>} : vector<16x16xf32>, vector<16x32xf32>, vector<16x32xf32> -> vector<16x32xf32>
    %67 = vector.extract_strided_slice %21 {offsets = [0, 16], sizes = [16, 8], strides = [1, 1]} : vector<16x32xf32> to vector<16x8xf32>
    %68 = vector.extract_strided_slice %28 {offsets = [0, 16], sizes = [16, 8], strides = [1, 1]} : vector<16x32xf32> to vector<16x8xf32>
    "tpu.trace_start"() <{level = 10 : i32, message = "qd,kd->qk"}> : () -> ()
    %cst_22 = arith.constant dense<0.000000e+00> : vector<16x16xf32>
    %69 = tpu.matmul %67, %68, %cst_22 {dimension_numbers = #tpu.dot_dimension_numbers<[1], [1], [0], [0], [0, 0, 1, 0], [], []>} : vector<16x8xf32>, vector<16x8xf32>, vector<16x16xf32> -> vector<16x16xf32>
    "tpu.trace_stop"() : () -> ()
    %70 = arith.addf %69, %34 : vector<16x16xf32>
    %cst_23 = arith.constant dense<0xFF800000> : vector<16xf32>
    %71 = vector.multi_reduction <maximumf>, %70, %cst_23 [1] : vector<16x16xf32> to vector<16xf32>
    %72 = vector.shape_cast %71 : vector<16xf32> to vector<16x1xf32>
    %73 = vector.broadcast %72 : vector<16x1xf32> to vector<16x16xf32>
    %74 = arith.subf %70, %73 : vector<16x16xf32>
    %75 = math.exp %74 : vector<16x16xf32>
    %cst_24 = arith.constant dense<0.000000e+00> : vector<16xf32>
    %76 = vector.multi_reduction <add>, %75, %cst_24 [1] : vector<16x16xf32> to vector<16xf32>
    %77 = vector.shape_cast %76 : vector<16xf32> to vector<16x1xf32>
    %78 = tpu.reciprocal %77 : vector<16x1xf32> -> vector<16x1xf32>
    %79 = vector.broadcast %78 : vector<16x1xf32> to vector<16x16xf32>
    %80 = arith.mulf %75, %79 : vector<16x16xf32>
    %81 = vector.extract_strided_slice %33 {offsets = [0, 64], sizes = [16, 32], strides = [1, 1]} : vector<16x128xf32> to vector<16x32xf32>
    %cst_25 = arith.constant dense<0.000000e+00> : vector<16x32xf32>
    %82 = tpu.matmul %80, %81, %cst_25 {dimension_numbers = #tpu.dot_dimension_numbers<[1], [0], [0], [1], [0, 0, 1, 1], [], []>} : vector<16x16xf32>, vector<16x32xf32>, vector<16x32xf32> -> vector<16x32xf32>
    %83 = vector.extract_strided_slice %21 {offsets = [0, 24], sizes = [16, 8], strides = [1, 1]} : vector<16x32xf32> to vector<16x8xf32>
    %84 = vector.extract_strided_slice %28 {offsets = [0, 24], sizes = [16, 8], strides = [1, 1]} : vector<16x32xf32> to vector<16x8xf32>
    "tpu.trace_start"() <{level = 10 : i32, message = "qd,kd->qk"}> : () -> ()
    %cst_26 = arith.constant dense<0.000000e+00> : vector<16x16xf32>
    %85 = tpu.matmul %83, %84, %cst_26 {dimension_numbers = #tpu.dot_dimension_numbers<[1], [1], [0], [0], [0, 0, 1, 0], [], []>} : vector<16x8xf32>, vector<16x8xf32>, vector<16x16xf32> -> vector<16x16xf32>
    "tpu.trace_stop"() : () -> ()
    %86 = arith.addf %85, %34 : vector<16x16xf32>
    %cst_27 = arith.constant dense<0xFF800000> : vector<16xf32>
    %87 = vector.multi_reduction <maximumf>, %86, %cst_27 [1] : vector<16x16xf32> to vector<16xf32>
    %88 = vector.shape_cast %87 : vector<16xf32> to vector<16x1xf32>
    %89 = vector.broadcast %88 : vector<16x1xf32> to vector<16x16xf32>
    %90 = arith.subf %86, %89 : vector<16x16xf32>
    %91 = math.exp %90 : vector<16x16xf32>
    %cst_28 = arith.constant dense<0.000000e+00> : vector<16xf32>
    %92 = vector.multi_reduction <add>, %91, %cst_28 [1] : vector<16x16xf32> to vector<16xf32>
    %93 = vector.shape_cast %92 : vector<16xf32> to vector<16x1xf32>
    %94 = tpu.reciprocal %93 : vector<16x1xf32> -> vector<16x1xf32>
    %95 = vector.broadcast %94 : vector<16x1xf32> to vector<16x16xf32>
    %96 = arith.mulf %91, %95 : vector<16x16xf32>
    %97 = vector.extract_strided_slice %33 {offsets = [0, 96], sizes = [16, 32], strides = [1, 1]} : vector<16x128xf32> to vector<16x32xf32>
    %cst_29 = arith.constant dense<0.000000e+00> : vector<16x32xf32>
    %98 = tpu.matmul %96, %97, %cst_29 {dimension_numbers = #tpu.dot_dimension_numbers<[1], [0], [0], [1], [0, 0, 1, 1], [], []>} : vector<16x16xf32>, vector<16x32xf32>, vector<16x32xf32> -> vector<16x32xf32>
    %99 = arith.addf %50, %66 : vector<16x32xf32>
    %100 = arith.addf %99, %82 : vector<16x32xf32>
    %101 = arith.addf %100, %98 : vector<16x32xf32>
    %102 = vector.broadcast %6 : vector<1x32xf32> to vector<16x32xf32>
    %103 = arith.addf %101, %102 : vector<16x32xf32>
    %104 = arith.addf %103, %2 : vector<16x32xf32>
    %cst_30 = arith.constant dense<0.000000e+00> : vector<16xf32>
    %105 = vector.multi_reduction <add>, %104, %cst_30 [1] : vector<16x32xf32> to vector<16xf32>
    %106 = vector.shape_cast %105 : vector<16xf32> to vector<16x1xf32>
    %cst_31 = arith.constant 3.200000e+01 : f32
    %107 = vector.broadcast %cst_31 : f32 to vector<16x1xf32>
    %108 = arith.divf %106, %107 : vector<16x1xf32>
    %109 = vector.broadcast %108 : vector<16x1xf32> to vector<16x32xf32>
    %110 = arith.subf %104, %109 : vector<16x32xf32>
    %111 = arith.mulf %110, %110 : vector<16x32xf32>
    %cst_32 = arith.constant dense<0.000000e+00> : vector<16xf32>
    %112 = vector.multi_reduction <add>, %111, %cst_32 [1] : vector<16x32xf32> to vector<16xf32>
    %113 = vector.shape_cast %112 : vector<16xf32> to vector<16x1xf32>
    %cst_33 = arith.constant 3.100000e+01 : f32
    %114 = vector.broadcast %cst_33 : f32 to vector<16x1xf32>
    %115 = arith.divf %113, %114 : vector<16x1xf32>
    %116 = math.sqrt %115 : vector<16x1xf32>
    %cst_34 = arith.constant 9.99999997E-7 : f32
    %117 = vector.broadcast %cst_34 : f32 to vector<16x1xf32>
    %118 = arith.addf %116, %117 : vector<16x1xf32>
    %119 = tpu.reciprocal %118 : vector<16x1xf32> -> vector<16x1xf32>
    %120 = vector.broadcast %119 : vector<16x1xf32> to vector<16x32xf32>
    %121 = arith.mulf %110, %120 : vector<16x32xf32>
    %122 = vector.broadcast %8 : vector<1x32xf32> to vector<16x32xf32>
    %123 = arith.mulf %122, %121 : vector<16x32xf32>
    %124 = vector.broadcast %9 : vector<1x32xf32> to vector<16x32xf32>
    %125 = arith.addf %123, %124 : vector<16x32xf32>
    %126 = vector.extract_strided_slice %14 {offsets = [1, 0, 0], sizes = [1, 32, 128], strides = [1, 1, 1]} : vector<2x32x128xf32> to vector<1x32x128xf32>
    %127 = vector.shape_cast %126 : vector<1x32x128xf32> to vector<32x128xf32>
    %cst_35 = arith.constant dense<0.000000e+00> : vector<16x128xf32>
    %128 = tpu.matmul %125, %127, %cst_35 {dimension_numbers = #tpu.dot_dimension_numbers<[1], [0], [0], [1], [0, 0, 1, 1], [], []>} : vector<16x32xf32>, vector<32x128xf32>, vector<16x128xf32> -> vector<16x128xf32>
    %129 = vector.broadcast %12 : vector<1x128xf32> to vector<16x128xf32>
    %130 = arith.addf %128, %129 : vector<16x128xf32>
    %cst_36 = arith.constant 0.000000e+00 : f32
    %131 = vector.broadcast %cst_36 : f32 to vector<16x128xf32>
    %132 = arith.maximumf %130, %131 : vector<16x128xf32>
    %c0_37 = arith.constant 0 : index
    %c0_38 = arith.constant 0 : index
    %133 = vector.load %arg4[%c0_37, %c0_38] : memref<128x32xf32, #tpu.memory_space<vmem>>, vector<128x32xf32>
    %cst_39 = arith.constant dense<0.000000e+00> : vector<16x32xf32>
    %134 = tpu.matmul %132, %133, %cst_39 {dimension_numbers = #tpu.dot_dimension_numbers<[1], [0], [0], [1], [0, 0, 1, 1], [], []>} : vector<16x128xf32>, vector<128x32xf32>, vector<16x32xf32> -> vector<16x32xf32>
    %135 = vector.broadcast %7 : vector<1x32xf32> to vector<16x32xf32>
    %136 = arith.addf %134, %135 : vector<16x32xf32>
    %137 = arith.addf %136, %125 : vector<16x32xf32>
    %cst_40 = arith.constant dense<0.000000e+00> : vector<16xf32>
    %138 = vector.multi_reduction <add>, %137, %cst_40 [1] : vector<16x32xf32> to vector<16xf32>
    %139 = vector.shape_cast %138 : vector<16xf32> to vector<16x1xf32>
    %cst_41 = arith.constant 3.200000e+01 : f32
    %140 = vector.broadcast %cst_41 : f32 to vector<16x1xf32>
    %141 = arith.divf %139, %140 : vector<16x1xf32>
    %142 = vector.broadcast %141 : vector<16x1xf32> to vector<16x32xf32>
    %143 = arith.subf %137, %142 : vector<16x32xf32>
    %144 = arith.mulf %143, %143 : vector<16x32xf32>
    %cst_42 = arith.constant dense<0.000000e+00> : vector<16xf32>
    %145 = vector.multi_reduction <add>, %144, %cst_42 [1] : vector<16x32xf32> to vector<16xf32>
    %146 = vector.shape_cast %145 : vector<16xf32> to vector<16x1xf32>
    %cst_43 = arith.constant 3.100000e+01 : f32
    %147 = vector.broadcast %cst_43 : f32 to vector<16x1xf32>
    %148 = arith.divf %146, %147 : vector<16x1xf32>
    %149 = math.sqrt %148 : vector<16x1xf32>
    %cst_44 = arith.constant 9.99999997E-7 : f32
    %150 = vector.broadcast %cst_44 : f32 to vector<16x1xf32>
    %151 = arith.addf %149, %150 : vector<16x1xf32>
    %152 = tpu.reciprocal %151 : vector<16x1xf32> -> vector<16x1xf32>
    %153 = vector.broadcast %152 : vector<16x1xf32> to vector<16x32xf32>
    %154 = arith.mulf %143, %153 : vector<16x32xf32>
    %155 = vector.broadcast %10 : vector<1x32xf32> to vector<16x32xf32>
    %156 = arith.mulf %155, %154 : vector<16x32xf32>
    %157 = vector.broadcast %11 : vector<1x32xf32> to vector<16x32xf32>
    %158 = arith.addf %156, %157 : vector<16x32xf32>
    %c0_45 = arith.constant 0 : index
    %c0_46 = arith.constant 0 : index
    %159 = vector.load %arg6[%c0_45, %c0_46] : memref<16x32xf32, #tpu.memory_space<vmem>>, vector<16x32xf32>
    tpu.vector_store %arg6[%c0_45, %c0_46], %158 {strides = array<i32>} : memref<16x32xf32, #tpu.memory_space<vmem>>, vector<16x32xf32>,
    return
  }
}

</mosaic_0001>

<bundles_post_ra>
// kernel: transformer_block.1
= control target key start
LH: loop header
LB: loop body
LE: loop exit
PB: predicated region body
PF: predicated region fallthrough
CT: control target
= control target key end

     0   :  { %vm51_vm0 = vcmask 261120   ;;  %v47_v3 = vlaneseq  ;;  %s2227_s0 = inlined_call_operand.vmem [shape: f32[3,16,32], index: 0, kind: input, shape index: {}]   ;;  %s2228_s1 = inlined_call_operand.vmem [shape: f32[16,16], index: 1, kind: input, shape index: {}]   ;;  %s2229_s2 = inlined_call_operand.vmem [shape: f32[2,32,32], index: 2, kind: input, shape index: {}]   ;;  %s2230_s3 = inlined_call_operand.vmem [shape: f32[2,32,128], index: 3, kind: input, shape index: {}]   ;;  %s2231_s4 = inlined_call_operand.vmem [shape: f32[128,32], index: 4, kind: input, shape index: {}]   ;;  %s2232_s5 = inlined_call_operand.vmem [shape: f32[8,128], index: 5, kind: input, shape index: {}]   ;;  %s2233_s6 = inlined_call_operand.hbm [shape: f32[16,32], index: 6, kind: output, shape index: {}]  }
   0x1   :  { %v31_v0 = vld [vmem:[%s2229_s2] sm:$0xff]  ;;  %v32_v1 = vld [vmem:[%s2229_s2 + $0x8] sm:$0xff]  ;;  %v33_v2 = vld [vmem:[%s2229_s2 + $0x10] sm:$0xff] }
   0x2   :  { %v1662_v4 = vpack.c.bf16 %v32_v1, %v31_v0  ;;  %v34_v5 = vld [vmem:[%s2229_s2 + $0x18] sm:$0xff]  ;;  %v1942_v6 = vld [vmem:[%s2227_s0] sm:$0xff]  ;;  %v36_v9 = vld [vmem:[%s2229_s2 + $0x28] sm:$0xff]  ;;  %v1952_v10 = vshrl.u32 %v47_v3, 7 }
   0x3   :  { %v1666_v7 = vpack.c.bf16 %v34_v5, %v33_v2  ;;  %1535 = vmatprep.mubr.msk.f32.mxu1 %vm51_vm0, %v1942_v6  ;;  %v35_v8 = vld [vmem:[%s2229_s2 + $0x20] sm:$0xff] }
   0x4   :  { %1663 = vmatprep.subr.bf16.mxu1 %v1662_v4  ;;  %v1957_v11 = vld [vmem:[%s2232_s5] sm:$0xff]  ;;  %v49_v12 = vsub.s32 0, %v1952_v10  ;;  %v1670_v13 = vpack.c.bf16 %v36_v9, %v35_v8 }
   0x5   :  { %1665 = vmatpush3.bf16.msra.mxu1 %v1662_v4 }
   0x6   :  { %1667 = vmatprep.subr.bf16.mxu1 %v1666_v7 }
   0x7   :  { %11 = vsyncpa [#allocation3], 0  ;;  %v37_v14 = vld [vmem:[%s2229_s2 + $0x30] sm:$0xff]  ;;  %v38_v15 = vld [vmem:[%s2229_s2 + $0x38] sm:$0xff]  ;;  %v1967_v16 = vrot.slane %v1957_v11, %v49_v12  ;;  %s1883_s18 = smov 96   ;;  %vm301_vm1 = vcmask 64512  }
   0x8   :  { %v1972_v17 = vld [vmem:[%s2227_s0 + $0x8] sm:$0xff]  ;;  %v1674_v18 = vpack.c.bf16 %v38_v15, %v37_v14  ;;  %v26_v19 = vld [vmem:[%s2227_s0 + $0x10] sm:$0xff]  ;;  %v39_v20 = vld [vmem:[%s2230_s3] sm:$0xff]  ;;  %s1884_s10 = smov 120   ;;  %vm389_vm3 = vcmask 130048   ;;  %s1885_s14 = smov 104  }
   0x9   :  { %1669 = vmatpush3.bf16.msra.mxu1 %v1666_v7  ;;  %134 = vrot.lane.b32.xlu0 %v1967_v16, %s1883_s18  ;;  %v40_v21 = vld [vmem:[%s2230_s3 + $0x8] sm:$0xff]  ;;  %v41_v23 = vld [vmem:[%s2230_s3 + $0x10] sm:$0xff]  ;;  %v42_v24 = vld [vmem:[%s2230_s3 + $0x18] sm:$0xff]  ;;  %s1887_s15 = smov 32   ;;  %s1888_s16 = smov 64  }
   0xa   :  { %1671 = vmatprep.subr.bf16.mxu1 %v1670_v13  ;;  %v1678_v22 = vpack.c.bf16 %v40_v21, %v39_v20  ;;  %v27_v25 = vld [vmem:[%s2227_s0 + $0x18] sm:$0xff]  ;;  %v1682_v26 = vpack.c.bf16 %v42_v24, %v41_v23  ;;  %v28_v27 = vld [vmem:[%s2227_s0 + $0x20] sm:$0xff]  ;;  %v29_v28 = vld [vmem:[%s2227_s0 + $0x28] sm:$0xff] }
   0xb   :  { %vm2014_vm2 = vmpackc.low %vm301_vm1, %vm301_vm1  ;;  %v2042_v52 = vld [vmem:[%s2228_s1 + $0x8] sm:$0xff]  ;;  %v2047_v54 = vld [vmem:[%s2228_s1] sm:$0xff]  ;;  %s1886_s1 = smov 112  }
   0xc   :  { %1536 = vmatmul.mubr.msk.f32.vlgmr.msra.gmra.mrb[0].mxu1 %vm51_vm0, %v1972_v17 }
   0xd   :  { %1673 = vmatpush3.bf16.msra.mxu1 %v1670_v13  ;;  %1546 = vmatprep.mubr.msk.f32.mxu1 %vm51_vm0, %v26_v19 }
   0xe   :  { %1675 = vmatprep.subr.bf16.mxu1 %v1674_v18 }
  0x11   :  { %1677 = vmatpush3.bf16.msra.mxu1 %v1674_v18 }
  0x12   :  { %1679 = vmatprep.subr.bf16.mxu1 %v1678_v22 }
  0x14   :  { %1547 = vmatmul.mubr.msk.f32.vlgmr.msra.gmra.mrb[2].mxu1 %vm51_vm0, %v27_v25 }
  0x15   :  { %1681 = vmatpush3.bf16.msra.mxu1 %v1678_v22  ;;  %1557 = vmatprep.mubr.msk.f32.mxu1 %vm51_vm0, %v28_v27 }
  0x16   :  { %1683 = vmatprep.subr.bf16.mxu1 %v1682_v26 }
  0x19   :  { %1685 = vmatpush3.bf16.msra.mxu1 %v1682_v26 }
  0x1c   :  { %1558 = vmatmul.mubr.msk.f32.vlgmr.msra.gmra.mrb[4].mxu1 %vm51_vm0, %v29_v28 }
  0x7b   :  { %v135_v33 = vpop.permute.xlu0 %134 }
  0xdf   :  { %v1537_v29 = vpop.f32.mrb[0].mxu1 }
  0xe0   :  { %v124_v30 = vpop.f32.mrb[1].mxu1  ;;  %v2009_v32 = vadd.f32 %v1537_v29, %v1967_v16 }
  0xe1   :  { %v125_v31 = vadd.f32 %v124_v30, %v1967_v16 }
  0xe3   :  { %412 = vrot.lane.b32.xlu1 %v125_v31, %s1884_s10  ;;  %1564 = vmatprep.mubr.msk.f32.mxu1 %vm301_vm1, %v125_v31 }
  0xe7   :  { %v1548_v34 = vpop.f32.mrb[2].mxu1  ;;  %414 = vrot.lane.b32.xlu1 %v2009_v32, %s1884_s10 }
  0xe8   :  { %v215_v35 = vadd.f32 %v1548_v34, %v135_v33  ;;  %v209_v36 = vpop.f32.mrb[3].mxu1 }
  0xe9   :  { %v210_v37 = vadd.f32 %v209_v36, %v135_v33 }
  0xeb   :  { %v2018_v39 = vpack.i.bf16 %v215_v35, %v210_v37  ;;  %v1686_v40 = vpack.c.bf16 %v215_v35, %v210_v37 }
  0xed   :  { %1782 = vrot.lane.b32.xlu0 %v2018_v39, %s1884_s10  ;;  %1688 = vmatprep.subr.msk.bf16.mxu1 %vm2014_vm2, %v1686_v40 }
  0xee   :  { %1691 = vmatpush3.bf16.xpose.msk.msra.mxu1 %vm2014_vm2, %v1686_v40 }
  0xef   :  { %v1559_v41 = vpop.f32.mrb[4].mxu1 }
  0xf0   :  { %v290_v42 = vpop.f32.mrb[5].mxu1 }
  0xf1   :  { %v2033_v49 = vpack.i.bf16 %v1559_v41, %v290_v42  ;;  %v2059_v60 = vpack.c.bf16 %v1559_v41, %v290_v42 }
  0xf5   :  { %1565 = vmatmul.mubr.msk.f32.vlgmr.msra.gmra.mrb[6].mxu1 %vm301_vm1, %v2009_v32 }
 0x155   :  { %v413_v43 = vpop.permute.xlu1 %412 }
 0x156   :  { %1571 = vmatprep.mubr.msk.f32.mxu0 %vm301_vm1, %v413_v43 }
 0x159   :  { %v415_v48 = vpop.permute.xlu1 %414 }
 0x15f   :  { %v1783_v44 = vpop.permute.xlu0 %1782 }
 0x160   :  { %v1785_v45 = vunpack.i.h.bf16 %v1783_v44  ;;  %v1784_v46 = vunpack.i.l.bf16 %v1783_v44 }
 0x162   :  { %v1692_v47 = vpack.c.bf16 %v1785_v45, %v1784_v46 }
 0x164   :  { %1694 = vmatprep.subr.msk.bf16.mxu0 %vm2014_vm2, %v1692_v47 }
 0x165   :  { %1697 = vmatpush3.bf16.xpose.msk.msra.mxu0 %vm2014_vm2, %v1692_v47 }
 0x16c   :  { %1572 = vmatmul.mubr.msk.f32.vlgmr.msra.gmra.mrb[0].mxu0 %vm301_vm1, %v415_v48 }
 0x1c8   :  { %v2035_v50 = vpop.f32.mrb[6].mxu1 }
 0x1c9   :  { %v2037_v51 = vpop.f32.mrb[7].mxu1  ;;  %v386_v46 = vadd.f32 %v2035_v50, %v2042_v52 }
 0x1ca   :  { %v381_v44 = vadd.f32 %v2037_v51, %v2047_v54 }
 0x1cc   :  { %v390_v48 = vsel %vm389_vm3, %v381_v44, -inf }
 0x23f   :  { %v1573_v53 = vpop.f32.mrb[0].mxu0 }
 0x240   :  { %v500_v55 = vadd.f32 %v1573_v53, %v2042_v52  ;;  %v494_v56 = vpop.f32.mrb[1].mxu0  ;;  %v393_v53 = vsel %vm389_vm3, %v386_v46, -inf }
 0x241   :  { %v495_v57 = vadd.f32 %v494_v56, %v2047_v54 }
 0x242   :  { %v506_v58 = vsel %vm389_vm3, %v500_v55, -inf }
 0x243   :  { %507 = vmax.xlane.f32.xlu1 %v506_v58  ;;  %v503_v59 = vsel %vm389_vm3, %v495_v57, -inf }
 0x244   :  { %504 = vmax.xlane.f32.xlu0 %v503_v59 }
 0x254   :  { %1787 = vrot.lane.b32.xlu1 %v2033_v49, %s1883_s18 }
 0x258   :  { %1797 = vrot.lane.b32.xlu1 %v2018_v39, %s1885_s14 }
 0x25c   :  { %614 = vrot.lane.b32.xlu1 %v125_v31, %s1886_s1 }
 0x260   :  { %814 = vrot.lane.b32.xlu1 %v125_v31, %s1885_s14 }
 0x2d0   :  { %v508_v61 = vpop.xlane.xlu1 %507 }
 0x2d1   :  { %v510_v62 = vsub.f32 %v500_v55, %v508_v61  ;;  %v505_v63 = vpop.xlane.xlu0 %504 }
 0x2d2   :  { %v509_v0 = vsub.f32 %v495_v57, %v505_v63 }
 0x2d3   :  { %v513_v1 = vmul.f32 1.442695, %v510_v62 }
 0x2d4   :  { %v511_v2 = vmul.f32 1.442695, %v509_v0  ;;  %v1788_v3 = vpop.permute.xlu1 %1787 }
 0x2d5   :  { %1811 = vpow2.f32 %v513_v1  ;;  %v1790_v4 = vunpack.i.h.bf16 %v1788_v3  ;;  %v1789_v5 = vunpack.i.l.bf16 %v1788_v3 }
 0x2d6   :  { %1813 = vpow2.f32 %v511_v2 }
 0x2d7   :  { %v1698_v7 = vpack.c.bf16 %v1790_v4, %v1789_v5 }
 0x2d8   :  { %v1798_v8 = vpop.permute.xlu1 %1797 }
 0x2d9   :  { %v1800_v9 = vunpack.i.h.bf16 %v1798_v8  ;;  %v1799_v12 = vunpack.i.l.bf16 %v1798_v8  ;;  %1699 = vmatprep.subr.bf16.mxu1 %v1698_v7 }
 0x2da   :  { %1701 = vmatpush3.bf16.msra.mxu1 %v1698_v7 }
 0x2db   :  { %v1712_v13 = vpack.c.bf16 %v1800_v9, %v1799_v12 }
 0x2dc   :  { %v615_v14 = vpop.permute.xlu1 %614 }
 0x2dd   :  { %1714 = vmatprep.subr.msk.bf16.mxu0 %vm2014_vm2, %v1712_v13 }
 0x2de   :  { %1717 = vmatpush3.bf16.xpose.msk.msra.mxu0 %vm2014_vm2, %v1712_v13 }
 0x2df   :  { %v1812_v15 = vpop.eup %1811 }
 0x2e0   :  { %v815_v18 = vpop.permute.xlu1 %814  ;;  %v518_v19 = vsel %vm389_vm3, %v1812_v15, 0.0  ;;  %v1814_v20 = vpop.eup %1813 }
 0x2e1   :  { %1599 = vmatprep.mubr.msk.f32.mxu0 %vm301_vm1, %v815_v18  ;;  %519 = vadd.xlane.f32.xlu0 %v518_v19  ;;  %v515_v21 = vsel %vm389_vm3, %v1814_v20, 0.0 }
 0x2e5   :  { %516 = vadd.xlane.f32.xlu0 %v515_v21 }
 0x2fb   :  { %1792 = vrot.lane.b32.xlu0 %v2018_v39, %s1886_s1 }
 0x2ff   :  { %616 = vrot.lane.b32.xlu0 %v2009_v32, %s1886_s1 }
 0x303   :  { %816 = vrot.lane.b32.xlu0 %v2009_v32, %s1885_s14 }
 0x36e   :  { %v520_v22 = vpop.xlane.xlu0 %519 }
 0x36f   :  { %1815 = vrcp.f32 %v520_v22 }
 0x372   :  { %v517_v23 = vpop.xlane.xlu0 %516 }
 0x373   :  { %1817 = vrcp.f32 %v517_v23 }
 0x376   :  { %v1793_v24 = vpop.permute.xlu0 %1792 }
 0x377   :  { %v1795_v25 = vunpack.i.h.bf16 %v1793_v24  ;;  %v1794_v26 = vunpack.i.l.bf16 %v1793_v24 }
 0x379   :  { %v1702_v27 = vpack.c.bf16 %v1795_v25, %v1794_v26  ;;  %v1816_v29 = vpop.eup %1815 }
 0x37a   :  { %v617_v28 = vpop.permute.xlu0 %616  ;;  %v524_v34 = vmul.f32 %v1816_v29, %v1812_v15 }
 0x37b   :  { %1704 = vmatprep.subr.msk.bf16.mxu1 %vm2014_vm2, %v1702_v27 }
 0x37d   :  { %v1818_v30 = vpop.eup %1817 }
 0x37e   :  { %v817_v31 = vpop.permute.xlu0 %816  ;;  %v523_v33 = vmul.f32 %v1818_v30, %v1814_v20 }
 0x37f   :  { %1600 = vmatmul.mubr.msk.f32.vlgmr.msra.gmra.mrb[2].mxu0 %vm301_vm1, %v817_v31 }
 0x380   :  { %1578 = vmatprep.mubr.msk.f32.mxu1 %vm389_vm3, %v523_v33 }
 0x381   :  { %1579 = vmatmul.mubr.msk.f32.vlgmr.msra.gmra.mrb[8].mxu1 %vm389_vm3, %v524_v34 }
 0x382   :  { %1707 = vmatpush3.bf16.xpose.msk.msra.mxu1 %vm2014_vm2, %v1702_v27  ;;  %1585 = vmatprep.mubr.msk.f32.mxu1 %vm301_vm1, %v615_v14 }
 0x389   :  { %1586 = vmatmul.mubr.msk.f32.vlgmr.msra.gmra.mrb[10].mxu1 %vm301_vm1, %v617_v28 }
 0x452   :  { %v1601_v32 = vpop.f32.mrb[2].mxu0 }
 0x453   :  { %v896_v35 = vpop.f32.mrb[3].mxu0  ;;  %v902_v43 = vadd.f32 %v1601_v32, %v2042_v52 }
 0x454   :  { %v897_v41 = vadd.f32 %v896_v35, %v2047_v54 }
 0x455   :  { %v908_v47 = vsel %vm389_vm3, %v902_v43, -inf }
 0x456   :  { %v905_v45 = vsel %vm389_vm3, %v897_v41, -inf }
 0x45c   :  { %v1587_v36 = vpop.f32.mrb[10].mxu1 }
 0x45d   :  { %v702_v37 = vadd.f32 %v1587_v36, %v2042_v52  ;;  %v696_v39 = vpop.f32.mrb[11].mxu1 }
 0x45e   :  { %v697_v40 = vadd.f32 %v696_v39, %v2047_v54 }
 0x45f   :  { %v708_v42 = vsel %vm389_vm3, %v702_v37, -inf }
 0x460   :  { %709 = vmax.xlane.f32.xlu0 %v708_v42  ;;  %v705_v38 = vsel %vm389_vm3, %v697_v40, -inf }
 0x461   :  { %706 = vmax.xlane.f32.xlu1 %v705_v38 }
 0x464   :  { %906 = vmax.xlane.f32.xlu0 %v905_v45 }
 0x465   :  { %909 = vmax.xlane.f32.xlu1 %v908_v47 }
 0x468   :  { %391 = vmax.xlane.f32.xlu0 %v390_v48 }
 0x469   :  { %394 = vmax.xlane.f32.xlu1 %v393_v53 }
 0x4ed   :  { %v710_v55 = vpop.xlane.xlu0 %709 }
 0x4ee   :  { %v707_v56 = vpop.xlane.xlu1 %706  ;;  %v712_v62 = vsub.f32 %v702_v37, %v710_v55 }
 0x4ef   :  { %v711_v59 = vsub.f32 %v697_v40, %v707_v56 }
 0x4f0   :  { %v715_v4 = vmul.f32 1.442695, %v712_v62 }
 0x4f1   :  { %v907_v57 = vpop.xlane.xlu0 %906  ;;  %v713_v2 = vmul.f32 1.442695, %v711_v59  ;;  %v1150_v59 = vsub.s32 1, %v1952_v10 }
 0x4f2   :  { %v911_v58 = vsub.f32 %v897_v41, %v907_v57  ;;  %v910_v51 = vpop.xlane.xlu1 %909 }
 0x4f3   :  { %v912_v54 = vsub.f32 %v902_v43, %v910_v51 }
 0x4f4   :  { %v913_v61 = vmul.f32 1.442695, %v911_v58 }
 0x4f5   :  { %v915_v50 = vmul.f32 1.442695, %v912_v54  ;;  %v392_v52 = vpop.xlane.xlu0 %391 }
 0x4f6   :  { %1819 = vpow2.f32 %v913_v61  ;;  %v396_v63 = vsub.f32 %v381_v44, %v392_v52  ;;  %v395_v0 = vpop.xlane.xlu1 %394  ;;  %v2123_v61 = vrot.slane %v1957_v11, %v1150_v59  ;;  %v1260_v59 = vld [vmem:[%s2231_s4 + $0x68] sm:$0xff] }
 0x4f7   :  { %1821 = vpow2.f32 %v915_v50  ;;  %v397_v1 = vsub.f32 %v386_v46, %v395_v0 }
 0x4f8   :  { %v398_v3 = vmul.f32 1.442695, %v396_v63 }
 0x4f9   :  { %v400_v5 = vmul.f32 1.442695, %v397_v1 }
 0x4fa   :  { %1823 = vpow2.f32 %v398_v3 }
 0x4fb   :  { %1825 = vpow2.f32 %v400_v5  ;;  %v44_v5 = vld [vmem:[%s2230_s3 + $0x28] sm:$0xff] }
 0x4fc   :  { %1827 = vpow2.f32 %v713_v2 }
 0x4fd   :  { %1829 = vpow2.f32 %v715_v4  ;;  %v43_v4 = vld [vmem:[%s2230_s3 + $0x20] sm:$0xff] }
 0x500   :  { %v1820_v7 = vpop.eup %1819 }
 0x501   :  { %v1822_v8 = vpop.eup %1821  ;;  %v917_v9 = vsel %vm389_vm3, %v1820_v7, 0.0 }
 0x502   :  { %918 = vadd.xlane.f32.xlu0 %v917_v9  ;;  %v920_v12 = vsel %vm389_vm3, %v1822_v8, 0.0  ;;  %v46_v9 = vld [vmem:[%s2230_s3 + $0x38] sm:$0xff] }
 0x503   :  { %921 = vadd.xlane.f32.xlu1 %v920_v12  ;;  %v1247_v12 = vld [vmem:[%s2231_s4] sm:$0xff] }
 0x504   :  { %v1824_v13 = vpop.eup %1823 }
 0x505   :  { %v1826_v14 = vpop.eup %1825  ;;  %v402_v15 = vsel %vm389_vm3, %v1824_v13, 0.0 }
 0x506   :  { %v1828_v18 = vpop.eup %1827  ;;  %403 = vadd.xlane.f32.xlu0 %v402_v15  ;;  %v405_v19 = vsel %vm389_vm3, %v1826_v14, 0.0 }
 0x507   :  { %v1830_v20 = vpop.eup %1829  ;;  %406 = vadd.xlane.f32.xlu1 %v405_v19  ;;  %v717_v21 = vsel %vm389_vm3, %v1828_v18, 0.0 }
 0x508   :  { %v720_v22 = vsel %vm389_vm3, %v1830_v20, 0.0 }
 0x50a   :  { %718 = vadd.xlane.f32.xlu0 %v717_v21 }
 0x50b   :  { %721 = vadd.xlane.f32.xlu1 %v720_v22 }
 0x51c   :  { %1807 = vrot.lane.b32.xlu1 %v2033_v49, %s1887_s15 }
 0x520   :  { %1802 = vrot.lane.b32.xlu0 %v2033_v49, %s1888_s16  ;;  %1099 = vrot.lane.b32.xlu1 %v1967_v16, %s1888_s16 }
 0x58f   :  { %v919_v23 = vpop.xlane.xlu0 %918 }
 0x590   :  { %v922_v24 = vpop.xlane.xlu1 %921  ;;  %1831 = vrcp.f32 %v919_v23 }
 0x593   :  { %v404_v25 = vpop.xlane.xlu0 %403 }
 0x594   :  { %v407_v26 = vpop.xlane.xlu1 %406 }
 0x597   :  { %v719_v27 = vpop.xlane.xlu0 %718 }
 0x598   :  { %1833 = vrcp.f32 %v719_v27  ;;  %v722_v28 = vpop.xlane.xlu1 %721 }
 0x599   :  { %1835 = vrcp.f32 %v722_v28 }
 0x59a   :  { %1837 = vrcp.f32 %v922_v24  ;;  %v1832_v36 = vpop.eup %1831 }
 0x59b   :  { %v1803_v29 = vpop.permute.xlu0 %1802  ;;  %1839 = vrcp.f32 %v404_v25  ;;  %v925_v42 = vmul.f32 %v1832_v36, %v1820_v7  ;;  %v1726_v7 = vpack.c.bf16 %v44_v5, %v43_v4 }
 0x59c   :  { %v1805_v30 = vunpack.i.h.bf16 %v1803_v29  ;;  %v1804_v31 = vunpack.i.l.bf16 %v1803_v29  ;;  %v1808_v33 = vpop.permute.xlu1 %1807  ;;  %1841 = vrcp.f32 %v407_v26 }
 0x59d   :  { %v1810_v34 = vunpack.i.h.bf16 %v1808_v33  ;;  %v1809_v32 = vunpack.i.l.bf16 %v1808_v33  ;;  %1727 = vmatprep.subr.bf16.mxu0 %v1726_v7 }
 0x59e   :  { %v1708_v35 = vpack.c.bf16 %v1805_v30, %v1804_v31  ;;  %1729 = vmatpush3.bf16.msra.mxu0 %v1726_v7 }
 0x59f   :  { %v1718_v49 = vpack.c.bf16 %v1810_v34, %v1809_v32 }
 0x5a0   :  { %1709 = vmatprep.subr.bf16.mxu1 %v1708_v35  ;;  %v1100_v48 = vpop.permute.xlu1 %1099 }
 0x5a1   :  { %1711 = vmatpush3.bf16.msra.mxu1 %v1708_v35 }
 0x5a2   :  { %v1834_v37 = vpop.eup %1833  ;;  %1719 = vmatprep.subr.bf16.mxu1 %v1718_v49 }
 0x5a3   :  { %v1836_v39 = vpop.eup %1835  ;;  %v725_v40 = vmul.f32 %v1834_v37, %v1828_v18 }
 0x5a4   :  { %v726_v41 = vmul.f32 %v1836_v39, %v1830_v20  ;;  %v1838_v43 = vpop.eup %1837 }
 0x5a5   :  { %1592 = vmatprep.mubr.msk.f32.mxu1 %vm389_vm3, %v725_v40  ;;  %v1840_v38 = vpop.eup %1839  ;;  %v926_v44 = vmul.f32 %v1838_v43, %v1822_v8  ;;  %v45_v8 = vld [vmem:[%s2230_s3 + $0x30] sm:$0xff] }
 0x5a6   :  { %1593 = vmatmul.mubr.msk.f32.vlgmr.msra.gmra.mrb[8].mxu1 %vm389_vm3, %v726_v41  ;;  %v410_v45 = vmul.f32 %v1840_v38, %v1824_v13  ;;  %v1842_v46 = vpop.eup %1841  ;;  %v1248_v13 = vld [vmem:[%s2231_s4 + $0x8] sm:$0xff]  ;;  %v1249_v40 = vld [vmem:[%s2231_s4 + $0x10] sm:$0xff]  ;;  %v1250_v41 = vld [vmem:[%s2231_s4 + $0x18] sm:$0xff] }
 0x5a7   :  { %1721 = vmatpush3.bf16.msra.mxu1 %v1718_v49  ;;  %1606 = vmatprep.mubr.msk.f32.mxu1 %vm389_vm3, %v925_v42  ;;  %v411_v47 = vmul.f32 %v1842_v46, %v1826_v14  ;;  %v1734_v14 = vpack.c.bf16 %v1248_v13, %v1247_v12  ;;  %v1738_v38 = vpack.c.bf16 %v1250_v41, %v1249_v40 }
 0x5a8   :  { %1723 = vmatprep.subr.bf16.mxu1 %v2059_v60 }
 0x5ae   :  { %1607 = vmatmul.mubr.msk.f32.vlgmr.msra.gmra.mrb[8].mxu1 %vm389_vm3, %v926_v44  ;;  %v1251_v44 = vld [vmem:[%s2231_s4 + $0x20] sm:$0xff] }
 0x5af   :  { %1725 = vmatpush3.bf16.msra.mxu1 %v2059_v60  ;;  %1613 = vmatprep.mubr.msk.f32.mxu1 %vm389_vm3, %v410_v45  ;;  %v1252_v45 = vld [vmem:[%s2231_s4 + $0x28] sm:$0xff] }
 0x5b0   :  { %v1742_v46 = vpack.c.bf16 %v1252_v45, %v1251_v44 }
 0x5b6   :  { %1614 = vmatmul.mubr.msk.f32.vlgmr.msra.gmra.mrb[8].mxu1 %vm389_vm3, %v411_v47  ;;  %v1253_v47 = vld [vmem:[%s2231_s4 + $0x30] sm:$0xff] }
 0x689   :  { %v1615_v53 = vpop.f32.mrb[8].mxu1 }
 0x68a   :  { %v1103_v55 = vadd.f32 %v1615_v53, %v1100_v48  ;;  %v1086_v56 = vpop.f32.mrb[9].mxu1 }
 0x68b   :  { %v1102_v57 = vadd.f32 %v1100_v48, %v1086_v56  ;;  %v1254_v48 = vld [vmem:[%s2231_s4 + $0x38] sm:$0xff]  ;;  %v1256_v56 = vld [vmem:[%s2231_s4 + $0x48] sm:$0xff] }
 0x68c   :  { %v1105_v58 = vadd.f32 %v1103_v55, %v1972_v17  ;;  %v1746_v53 = vpack.c.bf16 %v1254_v48, %v1253_v47  ;;  %v1255_v55 = vld [vmem:[%s2231_s4 + $0x40] sm:$0xff] }
 0x68d   :  { %v1104_v51 = vadd.f32 %v1102_v57, %v1942_v6  ;;  %v1750_v57 = vpack.c.bf16 %v1256_v56, %v1255_v55 }
 0x68e   :  { %v1109_v54 = vsel %vm51_vm0, %v1105_v58, 0.0 }
 0x68f   :  { %1110 = vadd.xlane.f32.xlu1 %v1109_v54  ;;  %v1106_v60 = vsel %vm51_vm0, %v1104_v51, 0.0 }
 0x690   :  { %1107 = vadd.xlane.f32.xlu0 %v1106_v60  ;;  %v1259_v60 = vld [vmem:[%s2231_s4 + $0x60] sm:$0xff] }
 0x6a0   :  { %1155 = vrot.lane.b32.xlu1 %v2123_v61, %s1883_s18 }
 0x71c   :  { %v1111_v62 = vpop.xlane.xlu1 %1110 }
 0x71d   :  { %v1114_v50 = vmul.f32 0.03125, %v1111_v62  ;;  %v1108_v52 = vpop.xlane.xlu0 %1107  ;;  %v1758_v62 = vpack.c.bf16 %v1260_v59, %v1259_v60 }
 0x71e   :  { %v1113_v17 = vmul.f32 0.03125, %v1108_v52  ;;  %v1262_v52 = vld [vmem:[%s2231_s4 + $0x78] sm:$0xff] }
 0x71f   :  { %v1116_v63 = vsub.f32 %v1105_v58, %v1114_v50  ;;  %v1257_v58 = vld [vmem:[%s2231_s4 + $0x50] sm:$0xff] }
 0x720   :  { %v1115_v6 = vsub.f32 %v1104_v51, %v1113_v17  ;;  %v2149_v35 = vpop.permute.xlu1 %1155  ;;  %v1258_v51 = vld [vmem:[%s2231_s4 + $0x58] sm:$0xff]  ;;  %v1261_v50 = vld [vmem:[%s2231_s4 + $0x70] sm:$0xff]  ;;  %s1889_s4 = smov [#allocation2]  }
 0x721   :  { %v1118_v2 = vmul.f32 %v1116_v63, %v1116_v63  ;;  %v1754_v54 = vpack.c.bf16 %v1258_v51, %v1257_v58  ;;  %v1762_v17 = vpack.c.bf16 %v1262_v52, %v1261_v50  ;;  %s1410_s3 = sshll.u32 %s1889_s4, 4  ;;  %s1411_s3 = int_to_ptr.vmem [resolvable:$true] %s1410_s3 }
 0x722   :  { %v1117_v0 = vmul.f32 %v1115_v6, %v1115_v6  ;;  %s1859_s27 = scalar_lea.vmem %s1411_s3, 256  ;;  %p1864_p1 = scmp.lt.s32.totalorder %s1411_s3, %s1411_s3 }
 0x723   :  { %v1122_v3 = vsel %vm51_vm0, %v1118_v2, 0.0  ;;  %p1860_p0 = scmp.ne.s32.totalorder %s1411_s3, %s1859_s27  ;;  %p1865_p2 = scmp.lt.s32.totalorder %s1859_s27, %s1859_s27 }
 0x724   :  { %v1119_v1 = vsel %vm51_vm0, %v1117_v0, 0.0 }
 0x725   :  { %1120 = vadd.xlane.f32.xlu0 %v1119_v1  ;;  %p1866_p3 = por %p1865_p2, %p1864_p1 }
 0x727   :  { %p1867_p4 = pnand %p1866_p3, %p1860_p0 }
 0x729   :  { %1123 = vadd.xlane.f32.xlu0 %v1122_v3 }
 0x73f   :  { %1263 = vrot.lane.b32.xlu0 %v1967_v16, %s1887_s15  ;;  %v1730_v16 = vpack.c.bf16 %v46_v9, %v45_v8 }
 0x741   :  { %1731 = vmatprep.subr.bf16.mxu0 %v1730_v16 }
 0x742   :  { %1733 = vmatpush3.bf16.msra.mxu0 %v1730_v16 }
 0x743   :  { %1735 = vmatprep.subr.bf16.mxu0 %v1734_v14 }
 0x7b2   :  { %v1121_v15 = vpop.xlane.xlu0 %1120 }
 0x7b3   :  { %v1126_v18 = vmul.f32 0.032258064, %v1121_v15 }
 0x7b5   :  { %1843 = vrsqrt.f32 %v1126_v18  ;;  %vm1130_vm4 = vcmp.eq.f32.partialorder %v1126_v18, inf  ;;  %v1133_v23 = vand.u32 2147483648, %v1126_v18  ;;  %vm1132_vm5 = vcmp.eq.f32.partialorder %v1126_v18, 0.0 }
 0x7b6   :  { %v1124_v19 = vpop.xlane.xlu0 %1123 }
 0x7b7   :  { %v1127_v20 = vmul.f32 0.032258064, %v1124_v19 }
 0x7b9   :  { %1845 = vrsqrt.f32 %v1127_v20  ;;  %vm1137_vm6 = vcmp.eq.f32.partialorder %v1127_v20, inf  ;;  %v1140_v29 = vand.u32 2147483648, %v1127_v20  ;;  %vm1139_vm7 = vcmp.eq.f32.partialorder %v1127_v20, 0.0 }
 0x7ba   :  { %v1264_v7 = vpop.permute.xlu0 %1263 }
 0x7bf   :  { %v1844_v21 = vpop.eup %1843 }
 0x7c0   :  { %v1129_v22 = vmul.f32 %v1844_v21, %v1126_v18 }
 0x7c2   :  { %v1131_v24 = vsel %vm1130_vm4, %v1126_v18, %v1129_v22 }
 0x7c3   :  { %v1846_v25 = vpop.eup %1845  ;;  %v1134_v26 = vsel %vm1132_vm5, %v1133_v23, %v1131_v24 }
 0x7c4   :  { %v1142_v27 = vadd.f32 1e-06, %v1134_v26  ;;  %v1136_v28 = vmul.f32 %v1846_v25, %v1127_v20 }
 0x7c6   :  { %v1138_v30 = vsel %vm1137_vm6, %v1127_v20, %v1136_v28  ;;  %1847 = vrcp.f32 %v1142_v27 }
 0x7c7   :  { %v1141_v31 = vsel %vm1139_vm7, %v1140_v29, %v1138_v30 }
 0x7c8   :  { %v1143_v33 = vadd.f32 1e-06, %v1141_v31 }
 0x7ca   :  { %1849 = vrcp.f32 %v1143_v33 }
 0x7d0   :  { %v1848_v34 = vpop.eup %1847 }
 0x7d1   :  { %v1146_v32 = vmul.f32 %v1848_v34, %v1115_v6 }
 0x7d3   :  { %v1152_v49 = vmul.f32 %v2123_v61, %v1146_v32 }
 0x7d4   :  { %v1850_v36 = vpop.eup %1849 }
 0x7d5   :  { %v1147_v37 = vmul.f32 %v1850_v36, %v1116_v63  ;;  %v1158_v39 = vadd.f32 %v2149_v35, %v1152_v49  ;;  %v1162_v63 = vsub.s32 2, %v1952_v10 }
 0x7d7   :  { %v1153_v42 = vmul.f32 %v2123_v61, %v1147_v37  ;;  %1624 = vmatprep.mubr.msk.f32.mxu0 %vm51_vm0, %v1158_v39  ;;  %v1163_v6 = vrot.slane %v1957_v11, %v1162_v63 }
 0x7d9   :  { %v1159_v43 = vadd.f32 %v2149_v35, %v1153_v42 }
 0x7db   :  { %1625 = vmatmul.mubr.msk.f32.vlgmr.msra.gmra.mrb[4].mxu0 %vm51_vm0, %v1159_v43 }
 0x7dc   :  { %1737 = vmatpush3.bf16.msra.mxu0 %v1734_v14 }
 0x7dd   :  { %1739 = vmatprep.subr.bf16.mxu0 %v1738_v38 }
 0x7e0   :  { %1741 = vmatpush3.bf16.msra.mxu0 %v1738_v38 }
 0x7e1   :  { %1743 = vmatprep.subr.bf16.mxu0 %v1742_v46 }
 0x7e4   :  { %1745 = vmatpush3.bf16.msra.mxu0 %v1742_v46 }
 0x7e5   :  { %1747 = vmatprep.subr.bf16.mxu0 %v1746_v53 }
 0x7e8   :  { %1749 = vmatpush3.bf16.msra.mxu0 %v1746_v53 }
 0x7e9   :  { %1751 = vmatprep.subr.bf16.mxu0 %v1750_v57 }
 0x7ec   :  { %1753 = vmatpush3.bf16.msra.mxu0 %v1750_v57 }
 0x7ed   :  { %1755 = vmatprep.subr.bf16.mxu0 %v1754_v54 }
 0x7f0   :  { %1757 = vmatpush3.bf16.msra.mxu0 %v1754_v54 }
 0x7f1   :  { %1759 = vmatprep.subr.bf16.mxu0 %v1758_v62 }
 0x7f4   :  { %1761 = vmatpush3.bf16.msra.mxu0 %v1758_v62 }
 0x7f5   :  { %1763 = vmatprep.subr.bf16.mxu0 %v1762_v17 }
 0x7f8   :  { %1765 = vmatpush3.bf16.msra.mxu0 %v1762_v17 }
 0x8ae   :  { %v1626_v0 = vpop.f32.mrb[4].mxu0 }
 0x8af   :  { %v1242_v1 = vadd.f32 %v1626_v0, %v1163_v6  ;;  %v1236_v2 = vpop.f32.mrb[5].mxu0 }
 0x8b0   :  { %v1237_v3 = vadd.f32 %v1236_v2, %v1163_v6 }
 0x8b1   :  { %v1246_v5 = vmax.f32 %v1242_v1, 0.0 }
 0x8b2   :  { %v1245_v4 = vmax.f32 %v1237_v3, 0.0 }
 0x8b4   :  { %1659 = vmatprep.mubr.f32.mxu0 %v1245_v4 }
 0x8b5   :  { %1660 = vmatmul.mubr.f32.vlgmr.msra.gmra.mrb[6].mxu0 %v1246_v5 }
 0x988   :  { %v1661_v8 = vpop.f32.mrb[6].mxu0 }
 0x989   :  { %v1338_v9 = vadd.f32 %v1661_v8, %v1264_v7  ;;  %v1332_v16 = vpop.f32.mrb[7].mxu0 }
 0x98a   :  { %v1333_v12 = vadd.f32 %v1332_v16, %v1264_v7 }
 0x98b   :  { %v1342_v13 = vadd.f32 %v1338_v9, %v1159_v43 }
 0x98c   :  { %v1341_v14 = vadd.f32 %v1333_v12, %v1158_v39 }
 0x98d   :  { %v1346_v15 = vsel %vm51_vm0, %v1342_v13, 0.0 }
 0x98e   :  { %1347 = vadd.xlane.f32.xlu0 %v1346_v15  ;;  %v1343_v10 = vsel %vm51_vm0, %v1341_v14, 0.0 }
 0x98f   :  { %1344 = vadd.xlane.f32.xlu1 %v1343_v10 }
 0xa1b   :  { %v1348_v11 = vpop.xlane.xlu0 %1347 }
 0xa1c   :  { %v1350_v18 = vmul.f32 0.03125, %v1348_v11  ;;  %v1345_v19 = vpop.xlane.xlu1 %1344 }
 0xa1d   :  { %v1349_v20 = vmul.f32 0.03125, %v1345_v19 }
 0xa1e   :  { %v1352_v21 = vsub.f32 %v1342_v13, %v1350_v18 }
 0xa1f   :  { %v1351_v22 = vsub.f32 %v1341_v14, %v1349_v20 }
 0xa20   :  { %v1354_v23 = vmul.f32 %v1352_v21, %v1352_v21 }
 0xa21   :  { %v1353_v24 = vmul.f32 %v1351_v22, %v1351_v22 }
 0xa22   :  { %v1358_v25 = vsel %vm51_vm0, %v1354_v23, 0.0 }
 0xa23   :  { %1359 = vadd.xlane.f32.xlu0 %v1358_v25  ;;  %v1355_v26 = vsel %vm51_vm0, %v1353_v24, 0.0 }
 0xa24   :  { %1356 = vadd.xlane.f32.xlu1 %v1355_v26 }
 0xab0   :  { %v1360_v27 = vpop.xlane.xlu0 %1359 }
 0xab1   :  { %v1362_v28 = vmul.f32 0.032258064, %v1360_v27  ;;  %v1357_v29 = vpop.xlane.xlu1 %1356 }
 0xab2   :  { %v1361_v30 = vmul.f32 0.032258064, %v1357_v29 }
 0xab3   :  { %1851 = vrsqrt.f32 %v1362_v28  ;;  %vm1372_vm8 = vcmp.eq.f32.partialorder %v1362_v28, inf  ;;  %v1375_v32 = vand.u32 2147483648, %v1362_v28  ;;  %vm1374_vm10 = vcmp.eq.f32.partialorder %v1362_v28, 0.0 }
 0xab4   :  { %1853 = vrsqrt.f32 %v1361_v30  ;;  %vm1365_vm9 = vcmp.eq.f32.partialorder %v1361_v30, inf  ;;  %v1368_v36 = vand.u32 2147483648, %v1361_v30  ;;  %vm1367_vm11 = vcmp.eq.f32.partialorder %v1361_v30, 0.0 }
 0xabd   :  { %v1852_v31 = vpop.eup %1851 }
 0xabe   :  { %v1854_v33 = vpop.eup %1853  ;;  %v1371_v34 = vmul.f32 %v1852_v31, %v1362_v28 }
 0xabf   :  { %v1364_v49 = vmul.f32 %v1854_v33, %v1361_v30 }
 0xac0   :  { %v1373_v37 = vsel %vm1372_vm8, %v1362_v28, %v1371_v34 }
 0xac1   :  { %v1376_v39 = vsel %vm1374_vm10, %v1375_v32, %v1373_v37  ;;  %v1366_v40 = vsel %vm1365_vm9, %v1361_v30, %v1364_v49 }
 0xac2   :  { %v1378_v41 = vadd.f32 1e-06, %v1376_v39  ;;  %v1369_v42 = vsel %vm1367_vm11, %v1368_v36, %v1366_v40 }
 0xac3   :  { %v1377_v43 = vadd.f32 1e-06, %v1369_v42 }
 0xac4   :  { %1855 = vrcp.f32 %v1378_v41 }
 0xac5   :  { %1857 = vrcp.f32 %v1377_v43 }
 0xace   :  { %v1856_v38 = vpop.eup %1855 }
 0xacf   :  { %v1858_v44 = vpop.eup %1857  ;;  %v1382_v45 = vmul.f32 %v1856_v38, %v1352_v21 }
 0xad0   :  { %v1381_v46 = vmul.f32 %v1858_v44, %v1351_v22 }
 0xad1   :  { %1387 = vrot.lane.b32.xlu0 %v1382_v45, %s1888_s16 }
 0xad2   :  { %1385 = vrot.lane.b32.xlu1 %v1381_v46, %s1888_s16 }
 0xb43   :  { %v1388_v47 = vpop.permute.xlu0 %1387 }
 0xb44   :  { %v1386_v48 = vpop.permute.xlu1 %1385  ;;  %v1392_v55 = vmul.f32 %v1388_v47, %v2123_v61 }
 0xb45   :  { %v1391_v53 = vmul.f32 %v1386_v48, %v2123_v61 }
 0xb46   :  { %v1394_v57 = vadd.f32 %v1392_v55, %v2149_v35 }
 0xb47   :  { %v1393_v56 = vadd.f32 %v1391_v53, %v2149_v35 }
 0xb49   :  { %1397 = vrot.lane.b32.xlu1 %v1393_v56, %s1888_s16 }
 0xb4d   :  { %1399 = vrot.lane.b32.xlu1 %v1394_v57, %s1888_s16 }
 0xbbb   :  { %v1398_v58 = vpop.permute.xlu1 %1397 }
 0xbbc   :  { %1403 = vst.msk [vmem:[#allocation2] sm:$0xff] %vm51_vm0, %v1398_v58 }
 0xbbf   :  { %v1400_v51 = vpop.permute.xlu1 %1399 }
 0xbc0   :  { %1404 = vst.msk [vmem:[#allocation2 + $0x8] sm:$0xff] %vm51_vm0, %v1400_v51 }
 0xbc1   :  { %1870 = shalt.err (!%p1867_p4)
}
 0xbc2   :  { %s1871_s16 = scalar_lea.hbm %s2233_s6, 256 }
 0xbc3   :  { %p1872_p5 = scmp.ne.s32.totalorder %s2233_s6, %s1871_s16  ;;  %p1875_p6 = scmp.lt.u32.totalorder %s1871_s16, %s2233_s6 }
 0xbc5   :  { %p1877_p7 = pnand %p1875_p6, %p1872_p5 }
 0xbc7   :  { %1880 = shalt.err (!%p1877_p7)
}
 0xbc8   :  { %s1890_s10 = smov 128   ;;  %s1891_s0 = smov 8  }
 0xbc9   :  { %1416 = dma.vmem_to_hbm [thread:$0]  %s1411_s3, 256, %s2233_s6, [#allocation3], %s1890_s10, %s1890_s10, %s1891_s0  }
 0xbca   :  { %1881 = dma.done.wait [#allocation3], 256  }
 0xbcb   :  { %1882 = vsyncadd [#allocation3], 4294967040 }
 0xbcc   :  { %1420 = vsyncpa [#allocation3], 1 }

</bundles_post_ra>
